<compile_context>
chip_gen: v5e
topology: v5e:2x2
jax: 0.10.0
libtpu: 0.0.40
codegen_flags: <defaults>
</compile_context>

<pallas_src>
import jax
import jax.numpy as jnp
import numpy as np
from jax.experimental import pallas as pl
from jax.experimental.pallas import tpu as pltpu

BN_EPS = 1e-5
LOG_EPS = 1e-6


def slda_kernel(nbows_ref, bows_ref, labels_ref,
                w1_ref, b1_ref, w2_ref, b2_ref,
                wms_ref, bms_ref, betas_ref, ww_ref, wb_ref,
                preds_ref, part_ref):
    K = betas_ref.shape[0]
    x = nbows_ref[...]                                            # (BT, V)

    # ---- encode: ReLU(Linear) x 2 (BatchNorm affines pre-folded into w2/b2, wms/bms) ----
    h = jnp.dot(x, w1_ref[...], preferred_element_type=jnp.float32) + b1_ref[...]
    h = jnp.maximum(h, 0.0)
    h = jnp.dot(h, w2_ref[...], preferred_element_type=jnp.float32) + b2_ref[...]
    h = jnp.maximum(h, 0.0)

    # ---- fused mu | logsigma projection: (BT, 2K) -> split ----
    ms = jnp.dot(h, wms_ref[...], preferred_element_type=jnp.float32) + bms_ref[...]
    mu = ms[:, :K]                                                # (BT, K)
    logsig = ms[:, K:]                                            # (BT, K)

    # KL(q(theta) || p(theta)) per row
    kld_rows = -0.5 * jnp.sum(1.0 + logsig - mu * mu - jnp.exp(logsig),
                              axis=-1, keepdims=True)             # (BT, 1)

    # ---- theta = softmax(z), z = mu (eval mode) ----
    m = jnp.max(mu, axis=-1, keepdims=True)
    e = jnp.exp(mu - m)
    theta = e * pl.reciprocal(jnp.sum(e, axis=-1, keepdims=True), approx=True)  # (BT, K)

    # ---- decode: beta = softmax over vocab (lane axis of the (K,V) layout) ----
    bl = betas_ref[...]                                           # (K, V)
    bm = jnp.max(bl, axis=-1, keepdims=True)
    be = jnp.exp(bl - bm)
    beta_kv = be * pl.reciprocal(jnp.sum(be, axis=-1, keepdims=True), approx=True)  # (K, V)

    prob = jnp.dot(theta, beta_kv, preferred_element_type=jnp.float32)  # (BT, V)
    preds = jnp.log(prob + LOG_EPS)
    preds_ref[...] = preds

    # ---- recon_loss rows: -(preds * bows).sum(1) ----
    recon_rows = -jnp.sum(preds * bows_ref[...], axis=1, keepdims=True)  # (BT, 1)

    # ---- predict_labels: log(theta+eps) . w + b, MSE vs labels (VPU reduce, no N=1 matmul) ----
    feat = jnp.log(theta + LOG_EPS)                               # (BT, K)
    pred = jnp.sum(feat * ww_ref[...], axis=-1, keepdims=True) + wb_ref[...]  # (BT, 1)
    diff = pred - labels_ref[...]                                 # (BT, 1)

    # ---- per-block partial sums packed into one lane-dense (8,128) tile ----
    recon_s = jnp.sum(recon_rows, axis=0, keepdims=True)          # (1, 1)
    sup_s = jnp.sum(diff * diff, axis=0, keepdims=True)           # (1, 1)
    kld_s = jnp.sum(kld_rows, axis=0, keepdims=True)              # (1, 1)

    lane = jax.lax.broadcasted_iota(jnp.int32, (8, 128), 1)
    packed = jnp.where(lane == 0, recon_s, jnp.zeros((8, 128), jnp.float32))
    packed = jnp.where(lane == 1, sup_s, packed)
    packed = jnp.where(lane == 2, kld_s, packed)
    part_ref[...] = packed


def prepare_params(p):
    """One-time parameter prep: fold eval-mode BN affines, fuse mu|logsig, transpose betas."""
    s1 = p["g1"] / np.sqrt(1.0 + BN_EPS)                          # (1, H)
    s2 = p["g2"] / np.sqrt(1.0 + BN_EPS)
    w2f = p["w2"] * s1.reshape(-1, 1)
    b2f = p["b2"] + p["be1"] @ p["w2"]
    wmu_f = p["wmu"] * s2.reshape(-1, 1)
    bmu_f = p["bmu"] + p["be2"] @ p["wmu"]
    wls_f = p["wls"] * s2.reshape(-1, 1)
    bls_f = p["bls"] + p["be2"] @ p["wls"]
    return {
        "w1": p["w1"], "b1": p["b1"],
        "w2": w2f, "b2": b2f,
        "wms": jnp.concatenate([wmu_f, wls_f], axis=1),           # (H, 2K)
        "bms": jnp.concatenate([bmu_f, bls_f], axis=1),           # (1, 2K)
        "betas_kv": p["betas"].T,                                 # (K, V)
        "ww": p["ww"].T,                                          # (1, K)
        "wb": p["wb"],                                            # (1, 1)
    }


def supervised_lda_forward(bows, nbows, labels, prep, *, batch_tile=None):
    """Returns (preds, recon_loss, supervised_loss, kld_theta) like SupervisedLDA.forward."""
    B, V = bows.shape
    H = prep["w1"].shape[1]
    K2 = prep["wms"].shape[1]
    K = prep["betas_kv"].shape[0]

    if batch_tile is None:
        batch_tile = 128 if (B % 128 == 0) else B
    assert B % batch_tile == 0
    gb = B // batch_tile
    bt = batch_tile

    const = lambda i: (0, 0)
    tiled = lambda i: (i, 0)

    preds, part = pl.pallas_call(
        slda_kernel,
        out_shape=(
            jax.ShapeDtypeStruct((B, V), jnp.float32),
            jax.ShapeDtypeStruct((gb * 8, 128), jnp.float32),
        ),
        grid=(gb,),
        in_specs=[
            pl.BlockSpec((bt, V), tiled),       # nbows
            pl.BlockSpec((bt, V), tiled),       # bows
            pl.BlockSpec((bt, 1), tiled),       # labels
            pl.BlockSpec((V, H), const),        # w1
            pl.BlockSpec((1, H), const),        # b1
            pl.BlockSpec((H, H), const),        # w2 (BN1 folded)
            pl.BlockSpec((1, H), const),        # b2 (BN1 folded)
            pl.BlockSpec((H, K2), const),       # wms = [wmu | wls] (BN2 folded)
            pl.BlockSpec((1, K2), const),       # bms
            pl.BlockSpec((K, V), const),        # betas (K, V)
            pl.BlockSpec((1, K), const),        # weights (row)
            pl.BlockSpec((1, 1), const),        # weights bias
        ],
        out_specs=(
            pl.BlockSpec((bt, V), tiled),       # preds
            pl.BlockSpec((8, 128), tiled),      # packed per-block partial sums
        ),
        compiler_params=pltpu.CompilerParams(
            dimension_semantics=("parallel",)),
    )(nbows, bows, labels.reshape(B, 1),
      prep["w1"], prep["b1"], prep["w2"], prep["b2"],
      prep["wms"], prep["bms"], prep["betas_kv"], prep["ww"], prep["wb"])

    part3 = part.reshape(gb, 8, 128)
    recon = jnp.sum(part3[:, 0, 0]) / B
    sup = jnp.sum(part3[:, 0, 1]) / B
    kld = jnp.sum(part3[:, 0, 2]) / B
    return preds, recon, sup, kld


def ref_forward(bows, nbows, labels, p):
    """Pure-JAX reference mirroring the PyTorch forward (eval mode, original params)."""
    s1 = p["g1"] / np.sqrt(1.0 + BN_EPS)
    s2 = p["g2"] / np.sqrt(1.0 + BN_EPS)
    h = jnp.maximum(nbows @ p["w1"] + p["b1"], 0.0)
    h = h * s1 + p["be1"]
    h = jnp.maximum(h @ p["w2"] + p["b2"], 0.0)
    h = h * s2 + p["be2"]
    mu = h @ p["wmu"] + p["bmu"]
    ls = h @ p["wls"] + p["bls"]
    kld = (-0.5 * jnp.sum(1.0 + ls - mu ** 2 - jnp.exp(ls), axis=-1)).mean()
    theta = jax.nn.softmax(mu, axis=-1)
    beta = jax.nn.softmax(p["betas"], axis=0).T
    preds = jnp.log(theta @ beta + LOG_EPS)
    recon = (-(preds * bows).sum(1)).mean()
    pred = jnp.log(theta + LOG_EPS) @ p["ww"] + p["wb"]
    sup = jnp.mean((pred[:, 0] - labels) ** 2)
    return preds, recon, sup, kld


if __name__ == "__main__":
    # Small shapes consistent with the module: bsz x V bag-of-words input.
    B, V, H, K = 8, 256, 128, 16   # batch, vocab_size, t_hidden_size, num_topics

    key = jax.random.PRNGKey(0)
    ks = jax.random.split(key, 16)

    # Deterministic params (torch-Linear weights stored pre-transposed as (in, out)).
    params = {
        "w1": jax.random.normal(ks[0], (V, H), jnp.float32) * 0.05,
        "b1": jax.random.normal(ks[1], (1, H), jnp.float32) * 0.05,
        "g1": 1.0 + 0.1 * jax.random.normal(ks[2], (1, H), jnp.float32),   # BN1 weight
        "be1": 0.1 * jax.random.normal(ks[3], (1, H), jnp.float32),        # BN1 bias
        "w2": jax.random.normal(ks[4], (H, H), jnp.float32) * 0.05,
        "b2": jax.random.normal(ks[5], (1, H), jnp.float32) * 0.05,
        "g2": 1.0 + 0.1 * jax.random.normal(ks[6], (1, H), jnp.float32),   # BN2 weight
        "be2": 0.1 * jax.random.normal(ks[7], (1, H), jnp.float32),        # BN2 bias
        "wmu": jax.random.normal(ks[8], (H, K), jnp.float32) * 0.05,
        "bmu": jax.random.normal(ks[9], (1, K), jnp.float32) * 0.05,
        "wls": jax.random.normal(ks[10], (H, K), jnp.float32) * 0.05,
        "bls": jax.random.normal(ks[11], (1, K), jnp.float32) * 0.05,
        "betas": jax.random.normal(ks[12], (V, K), jnp.float32),           # ~ torch.randn(V, K)
        "ww": jax.random.normal(ks[13], (K, 1), jnp.float32) * 0.1,        # self.weights
        "wb": jnp.full((1, 1), 0.01, jnp.float32),
        # TODO(synk): bow_weights / predict_with_bow path unused under default flags.
    }

    # Deterministic example inputs.
    bows = jnp.floor(jax.random.uniform(ks[14], (B, V), jnp.float32) * 5.0)
    nbows = bows / jnp.clip(bows.sum(axis=1, keepdims=True), 1.0, None)
    labels = jax.random.normal(ks[15], (B,), jnp.float32)

    prep = prepare_params(params)
    out = supervised_lda_forward(bows, nbows, labels, prep)
    out = jax.block_until_ready(out)

    ref = ref_forward(bows, nbows, labels, params)
    # Tolerance loosened slightly vs f32 exact because of approx-EUP reciprocals in the softmaxes.
    for a, b in zip(out, ref):
        np.testing.assert_allclose(np.asarray(a), np.asarray(b), rtol=2e-3, atol=2e-3)

    print("KERNEL_OK")
</pallas_src>

<mosaic_0001>
module attributes {stable_mosaic.version = 11 : i64} {
  func.func @slda_kernel(%arg0: i32, %arg1: memref<8x256xf32, #tpu.memory_space<vmem>>, %arg2: memref<8x256xf32, #tpu.memory_space<vmem>>, %arg3: memref<8x1xf32, #tpu.memory_space<vmem>>, %arg4: memref<256x128xf32, #tpu.memory_space<vmem>>, %arg5: memref<1x128xf32, #tpu.memory_space<vmem>>, %arg6: memref<128x128xf32, #tpu.memory_space<vmem>>, %arg7: memref<1x128xf32, #tpu.memory_space<vmem>>, %arg8: memref<128x32xf32, #tpu.memory_space<vmem>>, %arg9: memref<1x32xf32, #tpu.memory_space<vmem>>, %arg10: memref<16x256xf32, #tpu.memory_space<vmem>>, %arg11: memref<1x16xf32, #tpu.memory_space<vmem>>, %arg12: memref<1x1xf32, #tpu.memory_space<vmem>>, %arg13: memref<8x256xf32, #tpu.memory_space<vmem>>, %arg14: memref<8x128xf32, #tpu.memory_space<vmem>>) attributes {dimension_semantics = [#tpu.dimension_semantics<parallel>], iteration_bounds = array<i64: 1>, scalar_prefetch = 0 : i64, scratch_operands = 0 : i64, tpu.core_type = #tpu.core_type<tc>, window_params = [{transform_indices = @transform_0, window_bounds = array<i64: 8, 256>}, {transform_indices = @transform_1, window_bounds = array<i64: 8, 256>}, {transform_indices = @transform_2, window_bounds = array<i64: 8, 1>}, {pipeline_mode = #tpu.pipeline_mode<synchronous>, transform_indices = @transform_3, window_bounds = array<i64: 256, 128>}, {pipeline_mode = #tpu.pipeline_mode<synchronous>, transform_indices = @transform_4, window_bounds = array<i64: 1, 128>}, {pipeline_mode = #tpu.pipeline_mode<synchronous>, transform_indices = @transform_5, window_bounds = array<i64: 128, 128>}, {pipeline_mode = #tpu.pipeline_mode<synchronous>, transform_indices = @transform_6, window_bounds = array<i64: 1, 128>}, {pipeline_mode = #tpu.pipeline_mode<synchronous>, transform_indices = @transform_7, window_bounds = array<i64: 128, 32>}, {pipeline_mode = #tpu.pipeline_mode<synchronous>, transform_indices = @transform_8, window_bounds = array<i64: 1, 32>}, {pipeline_mode = #tpu.pipeline_mode<synchronous>, transform_indices = @transform_9, window_bounds = array<i64: 16, 256>}, {pipeline_mode = #tpu.pipeline_mode<synchronous>, transform_indices = @transform_10, window_bounds = array<i64: 1, 16>}, {pipeline_mode = #tpu.pipeline_mode<synchronous>, transform_indices = @transform_11, window_bounds = array<i64: 1, 1>}, {transform_indices = @transform_12, window_bounds = array<i64: 8, 256>}, {transform_indices = @transform_13, window_bounds = array<i64: 8, 128>}]} {
    %c0 = arith.constant 0 : index
    %c0_0 = arith.constant 0 : index
    %0 = vector.load %arg1[%c0, %c0_0] : memref<8x256xf32, #tpu.memory_space<vmem>>, vector<8x256xf32>
    %c0_1 = arith.constant 0 : index
    %c0_2 = arith.constant 0 : index
    %1 = vector.load %arg4[%c0_1, %c0_2] : memref<256x128xf32, #tpu.memory_space<vmem>>, vector<256x128xf32>
    %cst = arith.constant dense<0.000000e+00> : vector<8x128xf32>
    %2 = tpu.matmul %0, %1, %cst {dimension_numbers = #tpu.dot_dimension_numbers<[1], [0], [0], [1], [0, 0, 1, 1], [], []>} : vector<8x256xf32>, vector<256x128xf32>, vector<8x128xf32> -> vector<8x128xf32>
    %c0_3 = arith.constant 0 : index
    %c0_4 = arith.constant 0 : index
    %3 = vector.load %arg5[%c0_3, %c0_4] : memref<1x128xf32, #tpu.memory_space<vmem>>, vector<1x128xf32>
    %4 = vector.broadcast %3 : vector<1x128xf32> to vector<8x128xf32>
    %5 = arith.addf %2, %4 : vector<8x128xf32>
    %cst_5 = arith.constant 0.000000e+00 : f32
    %6 = vector.broadcast %cst_5 : f32 to vector<8x128xf32>
    %7 = arith.maximumf %5, %6 : vector<8x128xf32>
    %c0_6 = arith.constant 0 : index
    %c0_7 = arith.constant 0 : index
    %8 = vector.load %arg6[%c0_6, %c0_7] : memref<128x128xf32, #tpu.memory_space<vmem>>, vector<128x128xf32>
    %cst_8 = arith.constant dense<0.000000e+00> : vector<8x128xf32>
    %9 = tpu.matmul %7, %8, %cst_8 {dimension_numbers = #tpu.dot_dimension_numbers<[1], [0], [0], [1], [0, 0, 1, 1], [], []>} : vector<8x128xf32>, vector<128x128xf32>, vector<8x128xf32> -> vector<8x128xf32>
    %c0_9 = arith.constant 0 : index
    %c0_10 = arith.constant 0 : index
    %10 = vector.load %arg7[%c0_9, %c0_10] : memref<1x128xf32, #tpu.memory_space<vmem>>, vector<1x128xf32>
    %11 = vector.broadcast %10 : vector<1x128xf32> to vector<8x128xf32>
    %12 = arith.addf %9, %11 : vector<8x128xf32>
    %cst_11 = arith.constant 0.000000e+00 : f32
    %13 = vector.broadcast %cst_11 : f32 to vector<8x128xf32>
    %14 = arith.maximumf %12, %13 : vector<8x128xf32>
    %c0_12 = arith.constant 0 : index
    %c0_13 = arith.constant 0 : index
    %15 = vector.load %arg8[%c0_12, %c0_13] : memref<128x32xf32, #tpu.memory_space<vmem>>, vector<128x32xf32>
    %cst_14 = arith.constant dense<0.000000e+00> : vector<8x32xf32>
    %16 = tpu.matmul %14, %15, %cst_14 {dimension_numbers = #tpu.dot_dimension_numbers<[1], [0], [0], [1], [0, 0, 1, 1], [], []>} : vector<8x128xf32>, vector<128x32xf32>, vector<8x32xf32> -> vector<8x32xf32>
    %c0_15 = arith.constant 0 : index
    %c0_16 = arith.constant 0 : index
    %17 = vector.load %arg9[%c0_15, %c0_16] : memref<1x32xf32, #tpu.memory_space<vmem>>, vector<1x32xf32>
    %18 = vector.broadcast %17 : vector<1x32xf32> to vector<8x32xf32>
    %19 = arith.addf %16, %18 : vector<8x32xf32>
    %20 = vector.extract_strided_slice %19 {offsets = [0, 0], sizes = [8, 16], strides = [1, 1]} : vector<8x32xf32> to vector<8x16xf32>
    %21 = vector.extract_strided_slice %19 {offsets = [0, 16], sizes = [8, 16], strides = [1, 1]} : vector<8x32xf32> to vector<8x16xf32>
    %cst_17 = arith.constant 1.000000e+00 : f32
    %22 = vector.broadcast %cst_17 : f32 to vector<8x16xf32>
    %23 = arith.addf %22, %21 : vector<8x16xf32>
    %24 = arith.mulf %20, %20 : vector<8x16xf32>
    %25 = arith.subf %23, %24 : vector<8x16xf32>
    %26 = math.exp %21 : vector<8x16xf32>
    %27 = arith.subf %25, %26 : vector<8x16xf32>
    %cst_18 = arith.constant dense<0.000000e+00> : vector<8xf32>
    %28 = vector.multi_reduction <add>, %27, %cst_18 [1] : vector<8x16xf32> to vector<8xf32>
    %29 = vector.shape_cast %28 : vector<8xf32> to vector<8x1xf32>
    %cst_19 = arith.constant -5.000000e-01 : f32
    %30 = vector.broadcast %cst_19 : f32 to vector<8x1xf32>
    %31 = arith.mulf %30, %29 : vector<8x1xf32>
    %cst_20 = arith.constant dense<0xFF800000> : vector<8xf32>
    %32 = vector.multi_reduction <maximumf>, %20, %cst_20 [1] : vector<8x16xf32> to vector<8xf32>
    %33 = vector.shape_cast %32 : vector<8xf32> to vector<8x1xf32>
    %34 = vector.broadcast %33 : vector<8x1xf32> to vector<8x16xf32>
    %35 = arith.subf %20, %34 : vector<8x16xf32>
    %36 = math.exp %35 : vector<8x16xf32>
    %cst_21 = arith.constant dense<0.000000e+00> : vector<8xf32>
    %37 = vector.multi_reduction <add>, %36, %cst_21 [1] : vector<8x16xf32> to vector<8xf32>
    %38 = vector.shape_cast %37 : vector<8xf32> to vector<8x1xf32>
    %39 = tpu.reciprocal %38 {approx = true} : vector<8x1xf32> -> vector<8x1xf32>
    %40 = vector.broadcast %39 : vector<8x1xf32> to vector<8x16xf32>
    %41 = arith.mulf %36, %40 : vector<8x16xf32>
    %c0_22 = arith.constant 0 : index
    %c0_23 = arith.constant 0 : index
    %42 = vector.load %arg10[%c0_22, %c0_23] : memref<16x256xf32, #tpu.memory_space<vmem>>, vector<16x256xf32>
    %cst_24 = arith.constant dense<0xFF800000> : vector<16xf32>
    %43 = vector.multi_reduction <maximumf>, %42, %cst_24 [1] : vector<16x256xf32> to vector<16xf32>
    %44 = vector.shape_cast %43 : vector<16xf32> to vector<16x1xf32>
    %45 = vector.broadcast %44 : vector<16x1xf32> to vector<16x256xf32>
    %46 = arith.subf %42, %45 : vector<16x256xf32>
    %47 = math.exp %46 : vector<16x256xf32>
    %cst_25 = arith.constant dense<0.000000e+00> : vector<16xf32>
    %48 = vector.multi_reduction <add>, %47, %cst_25 [1] : vector<16x256xf32> to vector<16xf32>
    %49 = vector.shape_cast %48 : vector<16xf32> to vector<16x1xf32>
    %50 = tpu.reciprocal %49 {approx = true} : vector<16x1xf32> -> vector<16x1xf32>
    %51 = vector.broadcast %50 : vector<16x1xf32> to vector<16x256xf32>
    %52 = arith.mulf %47, %51 : vector<16x256xf32>
    %cst_26 = arith.constant dense<0.000000e+00> : vector<8x256xf32>
    %53 = tpu.matmul %41, %52, %cst_26 {dimension_numbers = #tpu.dot_dimension_numbers<[1], [0], [0], [1], [0, 0, 1, 1], [], []>} : vector<8x16xf32>, vector<16x256xf32>, vector<8x256xf32> -> vector<8x256xf32>
    %cst_27 = arith.constant 9.99999997E-7 : f32
    %54 = vector.broadcast %cst_27 : f32 to vector<8x256xf32>
    %55 = arith.addf %53, %54 : vector<8x256xf32>
    %56 = math.log %55 : vector<8x256xf32>
    %c0_28 = arith.constant 0 : index
    %c0_29 = arith.constant 0 : index
    %57 = vector.load %arg13[%c0_28, %c0_29] : memref<8x256xf32, #tpu.memory_space<vmem>>, vector<8x256xf32>
    tpu.vector_store %arg13[%c0_28, %c0_29], %56 {strides = array<i32>} : memref<8x256xf32, #tpu.memory_space<vmem>>, vector<8x256xf32>,
    %c0_30 = arith.constant 0 : index
    %c0_31 = arith.constant 0 : index
    %58 = vector.load %arg2[%c0_30, %c0_31] : memref<8x256xf32, #tpu.memory_space<vmem>>, vector<8x256xf32>
    %59 = arith.mulf %56, %58 : vector<8x256xf32>
    %cst_32 = arith.constant dense<0.000000e+00> : vector<8xf32>
    %60 = vector.multi_reduction <add>, %59, %cst_32 [1] : vector<8x256xf32> to vector<8xf32>
    %61 = vector.shape_cast %60 : vector<8xf32> to vector<8x1xf32>
    %cst_33 = arith.constant 0.000000e+00 : f32
    %62 = vector.broadcast %cst_33 : f32 to vector<8x1xf32>
    %63 = arith.subf %62, %61 : vector<8x1xf32>
    %cst_34 = arith.constant 9.99999997E-7 : f32
    %64 = vector.broadcast %cst_34 : f32 to vector<8x16xf32>
    %65 = arith.addf %41, %64 : vector<8x16xf32>
    %66 = math.log %65 : vector<8x16xf32>
    %c0_35 = arith.constant 0 : index
    %c0_36 = arith.constant 0 : index
    %67 = vector.load %arg11[%c0_35, %c0_36] : memref<1x16xf32, #tpu.memory_space<vmem>>, vector<1x16xf32>
    %68 = vector.broadcast %67 : vector<1x16xf32> to vector<8x16xf32>
    %69 = arith.mulf %66, %68 : vector<8x16xf32>
    %cst_37 = arith.constant dense<0.000000e+00> : vector<8xf32>
    %70 = vector.multi_reduction <add>, %69, %cst_37 [1] : vector<8x16xf32> to vector<8xf32>
    %71 = vector.shape_cast %70 : vector<8xf32> to vector<8x1xf32>
    %c0_38 = arith.constant 0 : index
    %c0_39 = arith.constant 0 : index
    %72 = vector.load %arg12[%c0_38, %c0_39] : memref<1x1xf32, #tpu.memory_space<vmem>>, vector<1x1xf32>
    %73 = vector.broadcast %72 : vector<1x1xf32> to vector<8x1xf32>
    %74 = arith.addf %71, %73 : vector<8x1xf32>
    %c0_40 = arith.constant 0 : index
    %c0_41 = arith.constant 0 : index
    %75 = vector.load %arg3[%c0_40, %c0_41] : memref<8x1xf32, #tpu.memory_space<vmem>>, vector<8x1xf32>
    %76 = arith.subf %74, %75 : vector<8x1xf32>
    %cst_42 = arith.constant dense<0.000000e+00> : vector<1xf32>
    %77 = vector.multi_reduction <add>, %63, %cst_42 [0] : vector<8x1xf32> to vector<1xf32>
    %78 = vector.shape_cast %77 : vector<1xf32> to vector<1x1xf32>
    %79 = arith.mulf %76, %76 : vector<8x1xf32>
    %cst_43 = arith.constant dense<0.000000e+00> : vector<1xf32>
    %80 = vector.multi_reduction <add>, %79, %cst_43 [0] : vector<8x1xf32> to vector<1xf32>
    %81 = vector.shape_cast %80 : vector<1xf32> to vector<1x1xf32>
    %cst_44 = arith.constant dense<0.000000e+00> : vector<1xf32>
    %82 = vector.multi_reduction <add>, %31, %cst_44 [0] : vector<8x1xf32> to vector<1xf32>
    %83 = vector.shape_cast %82 : vector<1xf32> to vector<1x1xf32>
    %84 = tpu.iota {dimensions = array<i32: 1>} : vector<8x128xi32>
    %c0_i32 = arith.constant 0 : i32
    %85 = vector.broadcast %c0_i32 : i32 to vector<8x128xi32>
    %86 = arith.cmpi eq, %84, %85 : vector<8x128xi32>
    %cst_45 = arith.constant 0.000000e+00 : f32
    %87 = vector.broadcast %cst_45 : f32 to vector<8x128xf32>
    %88 = vector.shape_cast %78 : vector<1x1xf32> to vector<1x1xf32>
    %89 = vector.broadcast %88 : vector<1x1xf32> to vector<8x128xf32>
    %90 = arith.select %86, %89, %87 : vector<8x128xi1>, vector<8x128xf32>
    %c1_i32 = arith.constant 1 : i32
    %91 = vector.broadcast %c1_i32 : i32 to vector<8x128xi32>
    %92 = arith.cmpi eq, %84, %91 : vector<8x128xi32>
    %93 = vector.shape_cast %81 : vector<1x1xf32> to vector<1x1xf32>
    %94 = vector.broadcast %93 : vector<1x1xf32> to vector<8x128xf32>
    %95 = arith.select %92, %94, %90 : vector<8x128xi1>, vector<8x128xf32>
    %c2_i32 = arith.constant 2 : i32
    %96 = vector.broadcast %c2_i32 : i32 to vector<8x128xi32>
    %97 = arith.cmpi eq, %84, %96 : vector<8x128xi32>
    %98 = vector.shape_cast %83 : vector<1x1xf32> to vector<1x1xf32>
    %99 = vector.broadcast %98 : vector<1x1xf32> to vector<8x128xf32>
    %100 = arith.select %97, %99, %95 : vector<8x128xi1>, vector<8x128xf32>
    %c0_46 = arith.constant 0 : index
    %c0_47 = arith.constant 0 : index
    %101 = vector.load %arg14[%c0_46, %c0_47] : memref<8x128xf32, #tpu.memory_space<vmem>>, vector<8x128xf32>
    tpu.vector_store %arg14[%c0_46, %c0_47], %100 {strides = array<i32>} : memref<8x128xf32, #tpu.memory_space<vmem>>, vector<8x128xf32>,
    return
  }
  func.func @transform_0(%arg0: i32) -> (i32, i32) {
    %c0_i32 = arith.constant 0 : i32
    %c0_i32_0 = arith.constant 0 : i32
    return %arg0, %c0_i32 : i32, i32
  }
  func.func @transform_1(%arg0: i32) -> (i32, i32) {
    %c0_i32 = arith.constant 0 : i32
    %c0_i32_0 = arith.constant 0 : i32
    return %arg0, %c0_i32 : i32, i32
  }
  func.func @transform_2(%arg0: i32) -> (i32, i32) {
    %c0_i32 = arith.constant 0 : i32
    %c0_i32_0 = arith.constant 0 : i32
    return %arg0, %c0_i32 : i32, i32
  }
  func.func @transform_3(%arg0: i32) -> (i32, i32) {
    %c0_i32 = arith.constant 0 : i32
    %c0_i32_0 = arith.constant 0 : i32
    %c0_i32_1 = arith.constant 0 : i32
    return %c0_i32, %c0_i32_0 : i32, i32
  }
  func.func @transform_4(%arg0: i32) -> (i32, i32) {
    %c0_i32 = arith.constant 0 : i32
    %c0_i32_0 = arith.constant 0 : i32
    %c0_i32_1 = arith.constant 0 : i32
    return %c0_i32, %c0_i32_0 : i32, i32
  }
  func.func @transform_5(%arg0: i32) -> (i32, i32) {
    %c0_i32 = arith.constant 0 : i32
    %c0_i32_0 = arith.constant 0 : i32
    %c0_i32_1 = arith.constant 0 : i32
    return %c0_i32, %c0_i32_0 : i32, i32
  }
  func.func @transform_6(%arg0: i32) -> (i32, i32) {
    %c0_i32 = arith.constant 0 : i32
    %c0_i32_0 = arith.constant 0 : i32
    %c0_i32_1 = arith.constant 0 : i32
    return %c0_i32, %c0_i32_0 : i32, i32
  }
  func.func @transform_7(%arg0: i32) -> (i32, i32) {
    %c0_i32 = arith.constant 0 : i32
    %c0_i32_0 = arith.constant 0 : i32
    %c0_i32_1 = arith.constant 0 : i32
    return %c0_i32, %c0_i32_0 : i32, i32
  }
  func.func @transform_8(%arg0: i32) -> (i32, i32) {
    %c0_i32 = arith.constant 0 : i32
    %c0_i32_0 = arith.constant 0 : i32
    %c0_i32_1 = arith.constant 0 : i32
    return %c0_i32, %c0_i32_0 : i32, i32
  }
  func.func @transform_9(%arg0: i32) -> (i32, i32) {
    %c0_i32 = arith.constant 0 : i32
    %c0_i32_0 = arith.constant 0 : i32
    %c0_i32_1 = arith.constant 0 : i32
    return %c0_i32, %c0_i32_0 : i32, i32
  }
  func.func @transform_10(%arg0: i32) -> (i32, i32) {
    %c0_i32 = arith.constant 0 : i32
    %c0_i32_0 = arith.constant 0 : i32
    %c0_i32_1 = arith.constant 0 : i32
    return %c0_i32, %c0_i32_0 : i32, i32
  }
  func.func @transform_11(%arg0: i32) -> (i32, i32) {
    %c0_i32 = arith.constant 0 : i32
    %c0_i32_0 = arith.constant 0 : i32
    %c0_i32_1 = arith.constant 0 : i32
    return %c0_i32, %c0_i32_0 : i32, i32
  }
  func.func @transform_12(%arg0: i32) -> (i32, i32) {
    %c0_i32 = arith.constant 0 : i32
    %c0_i32_0 = arith.constant 0 : i32
    return %arg0, %c0_i32 : i32, i32
  }
  func.func @transform_13(%arg0: i32) -> (i32, i32) {
    %c0_i32 = arith.constant 0 : i32
    %c0_i32_0 = arith.constant 0 : i32
    return %arg0, %c0_i32 : i32, i32
  }
}

</mosaic_0001>

<bundles_post_ra>
// kernel: tpu_custom_call.1
= control target key start
LH: loop header
LB: loop body
LE: loop exit
PB: predicated region body
PF: predicated region fallthrough
CT: control target
= control target key end

     0   :  { %s855_s0 = inlined_call_operand.hbm [shape: f32[8,256], index: 0, kind: input, shape index: {}]   ;;  %s856_s1 = inlined_call_operand.hbm [shape: f32[8,256], index: 1, kind: input, shape index: {}]   ;;  %s857_s2 = inlined_call_operand.vmem [shape: f32[8,1], index: 2, kind: input, shape index: {}]   ;;  %s858_s3 = inlined_call_operand.hbm [shape: f32[256,128], index: 3, kind: input, shape index: {}]   ;;  %s859_s4 = inlined_call_operand.vmem [shape: f32[1,128], index: 4, kind: input, shape index: {}]   ;;  %s860_s5 = inlined_call_operand.vmem [shape: f32[128,128], index: 5, kind: input, shape index: {}]   ;;  %s861_s6 = inlined_call_operand.vmem [shape: f32[1,128], index: 6, kind: input, shape index: {}]   ;;  %s862_s7 = inlined_call_operand.vmem [shape: f32[128,32], index: 7, kind: input, shape index: {}]   ;;  %s863_s8 = inlined_call_operand.vmem [shape: f32[1,32], index: 8, kind: input, shape index: {}]   ;;  %s864_s9 = inlined_call_operand.vmem [shape: f32[16,256], index: 9, kind: input, shape index: {}]   ;;  %s865_s10 = inlined_call_operand.vmem [shape: f32[1,16], index: 10, kind: input, shape index: {}]   ;;  %s866_s11 = inlined_call_operand.<no memory space> [shape: f32[1,1], index: 11, kind: input, shape index: {}]   ;;  %s867_s12 = inlined_call_operand.hbm [shape: f32[8,256], index: 12, kind: output, shape index: {0}]   ;;  %s868_s13 = inlined_call_operand.hbm [shape: f32[8,128], index: 13, kind: output, shape index: {1}]  }
   0x1   :  { %v19_v0 = vstv %s866_s11 }
   0x2   :  { %20 = vst [vmem:[#allocation2] sm:$0x1] %v19_v0 }
   0x3   :  { %21 = vsyncpa [#allocation4], 0 }
   0x4   :  { %22 = vsyncpa [#allocation7], 0 }
   0x5   :  { %23 = vsyncpa [#allocation5], 0  ;;  %s41_s29 = sshll.u32 %s856_s1, 4  ;;  %s42_s29 = int_to_ptr.hbm [resolvable:$true] %s41_s29 }
   0x6   :  { %24 = vsyncpa [#allocation11], 0  ;;  %s628_s30 = smov [#allocation6]   ;;  %s30_s17 = sshll.u32 %s855_s0, 4  ;;  %s31_s17 = int_to_ptr.hbm [resolvable:$true] %s30_s17 }
   0x7   :  { %s43_s14 = sshll.u32 %s628_s30, 4  ;;  %s629_s11 = smov [#allocation3]   ;;  %s44_s14 = int_to_ptr.vmem [resolvable:$true] %s43_s14 }
   0x8   :  { %46 = dma.hbm_to_vmem [thread:$0]  %s42_s29, 256, %s44_s14, [#allocation7]  }
   0x9   :  { %s32_s18 = sshll.u32 %s629_s11, 4  ;;  %s53_s21 = sshll.u32 %s858_s3, 4  ;;  %s33_s18 = int_to_ptr.vmem [resolvable:$true] %s32_s18  ;;  %s54_s21 = int_to_ptr.hbm [resolvable:$true] %s53_s21 }
   0xa   :  { %35 = dma.hbm_to_vmem [thread:$0]  %s31_s17, 256, %s33_s18, [#allocation4]  }
   0xb   :  { %s630_s1 = smov [#allocation8]   ;;  %s631_s23 = smov 128  }
   0xc   :  { %s55_s22 = sshll.u32 %s630_s1, 4  ;;  %s632_s24 = smov 8   ;;  %s56_s22 = int_to_ptr.vmem [resolvable:$true] %s55_s22 }
   0xd   :  { %61 = dma.hbm_to_vmem [thread:$0]  %s54_s21, 4096, %s56_s22, [#allocation7], %s631_s23, %s631_s23, %s632_s24  }
   0xe   :  { %620 = dma.done.wait [#allocation4], 256  }
   0xf   :  { %621 = vsyncadd [#allocation4], 4294967040 }
  0x10   :  { %622 = dma.done.wait [#allocation7], 4352  }
  0x11   :  { %623 = vsyncadd [#allocation7], 4294962944  ;;  %v107_v1 = vld [vmem:[#allocation8 + $0x78] sm:$0xff]  ;;  %v106_v2 = vld [vmem:[#allocation8 + $0x70] sm:$0xff]  ;;  %vm264_vm0 = vcmask 130048   ;;  %vm396_vm1 = vcmask 7168  }
  0x12   :  { %v123_v3 = vld [vmem:[#allocation8 + $0xf8] sm:$0xff]  ;;  %128 = vmatpush.msra.mxu0 %v107_v1  ;;  %v122_v4 = vld [vmem:[#allocation8 + $0xf0] sm:$0xff]  ;;  %v105_v5 = vld [vmem:[#allocation8 + $0x68] sm:$0xff]  ;;  %s431_s19 = sshll.u32 %s867_s12, 4  ;;  %s636_s20 = smov [#allocation9]   ;;  %s432_s19 = int_to_ptr.hbm [resolvable:$true] %s431_s19 }
  0x13   :  { %148 = vmatpush.msra.mxu1 %v123_v3  ;;  %v121_v6 = vld [vmem:[#allocation8 + $0xe8] sm:$0xff]  ;;  %v104_v7 = vld [vmem:[#allocation8 + $0x60] sm:$0xff]  ;;  %v103_v9 = vld [vmem:[#allocation8 + $0x58] sm:$0xff]  ;;  %s429_s21 = sshll.u32 %s636_s20, 4  ;;  %s637_s12 = smov [#allocation10]   ;;  %s430_s21 = int_to_ptr.vmem [resolvable:$true] %s429_s21 }
  0x14   :  { %129 = vmatpush.msra.mxu0 %v106_v2  ;;  %v120_v8 = vld [vmem:[#allocation8 + $0xe0] sm:$0xff]  ;;  %v119_v10 = vld [vmem:[#allocation8 + $0xd8] sm:$0xff]  ;;  %v102_v11 = vld [vmem:[#allocation8 + $0x50] sm:$0xff]  ;;  %s440_s1 = sshll.u32 %s637_s12, 4  ;;  %s442_s23 = sshll.u32 %s868_s13, 4  ;;  %s441_s1 = int_to_ptr.vmem [resolvable:$true] %s440_s1  ;;  %s443_s23 = int_to_ptr.hbm [resolvable:$true] %s442_s23 }
  0x15   :  { %149 = vmatpush.msra.mxu1 %v122_v4  ;;  %v118_v12 = vld [vmem:[#allocation8 + $0xd0] sm:$0xff]  ;;  %v101_v13 = vld [vmem:[#allocation8 + $0x48] sm:$0xff]  ;;  %v100_v17 = vld [vmem:[#allocation8 + $0x40] sm:$0xff] }
  0x16   :  { %130 = vmatpush.msra.mxu0 %v105_v5  ;;  %v117_v14 = vld [vmem:[#allocation8 + $0xc8] sm:$0xff]  ;;  %v184_v15 = vld [vmem:[%s860_s5 + $0x78] sm:$0xff]  ;;  %v116_v18 = vld [vmem:[#allocation8 + $0xc0] sm:$0xff] }
  0x17   :  { %150 = vmatpush.msra.mxu1 %v121_v6  ;;  %v183_v16 = vld [vmem:[%s860_s5 + $0x70] sm:$0xff]  ;;  %189 = vmatpush.msra.mxu2 %v184_v15  ;;  %v182_v19 = vld [vmem:[%s860_s5 + $0x68] sm:$0xff]  ;;  %v99_v20 = vld [vmem:[#allocation8 + $0x38] sm:$0xff] }
  0x18   :  { %131 = vmatpush.msra.mxu0 %v104_v7  ;;  %v98_v21 = vld [vmem:[#allocation8 + $0x30] sm:$0xff]  ;;  %v115_v22 = vld [vmem:[#allocation8 + $0xb8] sm:$0xff]  ;;  %v97_v26 = vld [vmem:[#allocation8 + $0x28] sm:$0xff] }
  0x19   :  { %151 = vmatpush.msra.mxu1 %v120_v8  ;;  %190 = vmatpush.msra.mxu2 %v183_v16  ;;  %v114_v23 = vld [vmem:[#allocation8 + $0xb0] sm:$0xff]  ;;  %v181_v24 = vld [vmem:[%s860_s5 + $0x60] sm:$0xff]  ;;  %v113_v27 = vld [vmem:[#allocation8 + $0xa8] sm:$0xff] }
  0x1a   :  { %132 = vmatpush.msra.mxu0 %v103_v9  ;;  %v180_v25 = vld [vmem:[%s860_s5 + $0x58] sm:$0xff]  ;;  %v179_v28 = vld [vmem:[%s860_s5 + $0x50] sm:$0xff]  ;;  %v96_v29 = vld [vmem:[#allocation8 + $0x20] sm:$0xff] }
  0x1b   :  { %152 = vmatpush.msra.mxu1 %v119_v10  ;;  %191 = vmatpush.msra.mxu2 %v182_v19  ;;  %v112_v30 = vld [vmem:[#allocation8 + $0xa0] sm:$0xff]  ;;  %v95_v32 = vld [vmem:[#allocation8 + $0x18] sm:$0xff]  ;;  %v94_v35 = vld [vmem:[#allocation8 + $0x10] sm:$0xff] }
  0x1c   :  { %133 = vmatpush.msra.mxu0 %v102_v11  ;;  %v178_v31 = vld [vmem:[%s860_s5 + $0x48] sm:$0xff]  ;;  %v111_v33 = vld [vmem:[#allocation8 + $0x98] sm:$0xff]  ;;  %v110_v36 = vld [vmem:[#allocation8 + $0x90] sm:$0xff] }
  0x1d   :  { %153 = vmatpush.msra.mxu1 %v118_v12  ;;  %192 = vmatpush.msra.mxu2 %v181_v24  ;;  %v177_v34 = vld [vmem:[%s860_s5 + $0x40] sm:$0xff]  ;;  %v176_v37 = vld [vmem:[%s860_s5 + $0x38] sm:$0xff]  ;;  %v93_v38 = vld [vmem:[#allocation8 + $0x8] sm:$0xff] }
  0x1e   :  { %134 = vmatpush.msra.mxu0 %v101_v13  ;;  %v109_v39 = vld [vmem:[#allocation8 + $0x88] sm:$0xff]  ;;  %v92_v41 = vld [vmem:[#allocation8] sm:$0xff]  ;;  %v172_v47 = vld [vmem:[%s860_s5 + $0x18] sm:$0xff] }
  0x1f   :  { %154 = vmatpush.msra.mxu1 %v117_v14  ;;  %193 = vmatpush.msra.mxu2 %v180_v25  ;;  %v175_v40 = vld [vmem:[%s860_s5 + $0x30] sm:$0xff]  ;;  %v108_v42 = vld [vmem:[#allocation8 + $0x80] sm:$0xff]  ;;  %v225_v51 = vld [vmem:[%s862_s7 + $0x78] sm:$0xff] }
  0x20   :  { %135 = vmatpush.msra.mxu0 %v100_v17  ;;  %v90_v43 = vld [vmem:[#allocation3] sm:$0xff]  ;;  %v91_v44 = vld [vmem:[#allocation3 + $0x8] sm:$0xff]  ;;  %230 = vmatpush.msra.mxu3 %v225_v51  ;;  %v283_v56 = vld [vmem:[%s864_s9 + $0x18] sm:$0xff] }
  0x21   :  { %155 = vmatpush.msra.mxu1 %v116_v18  ;;  %194 = vmatpush.msra.mxu2 %v179_v28  ;;  %v174_v45 = vld [vmem:[%s860_s5 + $0x28] sm:$0xff]  ;;  %v173_v46 = vld [vmem:[%s860_s5 + $0x20] sm:$0xff]  ;;  %v171_v48 = vld [vmem:[%s860_s5 + $0x10] sm:$0xff] }
  0x22   :  { %136 = vmatpush.msra.mxu0 %v99_v20  ;;  %v170_v49 = vld [vmem:[%s860_s5 + $0x8] sm:$0xff]  ;;  %v169_v50 = vld [vmem:[%s860_s5] sm:$0xff]  ;;  %v224_v52 = vld [vmem:[%s862_s7 + $0x70] sm:$0xff] }
  0x23   :  { %156 = vmatpush.msra.mxu1 %v115_v22  ;;  %195 = vmatpush.msra.mxu2 %v178_v31  ;;  %v223_v53 = vld [vmem:[%s862_s7 + $0x68] sm:$0xff]  ;;  %v222_v54 = vld [vmem:[%s862_s7 + $0x60] sm:$0xff]  ;;  %v282_v55 = vld [vmem:[%s864_s9 + $0x10] sm:$0xff] }
  0x24   :  { %137 = vmatpush.msra.mxu0 %v98_v21  ;;  %231 = vmatpush.msra.mxu3 %v224_v52  ;;  %v287_v57 = vmax.f32 %v282_v55, %v283_v56  ;;  %v221_v58 = vld [vmem:[%s862_s7 + $0x58] sm:$0xff]  ;;  %v220_v59 = vld [vmem:[%s862_s7 + $0x50] sm:$0xff]  ;;  %v219_v60 = vld [vmem:[%s862_s7 + $0x48] sm:$0xff] }
  0x25   :  { %157 = vmatpush.msra.mxu1 %v114_v23  ;;  %196 = vmatpush.msra.mxu2 %v177_v34  ;;  %v218_v61 = vld [vmem:[%s862_s7 + $0x40] sm:$0xff]  ;;  %v217_v62 = vld [vmem:[%s862_s7 + $0x38] sm:$0xff]  ;;  %v216_v63 = vld [vmem:[%s862_s7 + $0x30] sm:$0xff] }
  0x26   :  { %138 = vmatpush.msra.mxu0 %v97_v26  ;;  %232 = vmatpush.msra.mxu3 %v223_v53  ;;  %v215_v0 = vld [vmem:[%s862_s7 + $0x28] sm:$0xff]  ;;  %v214_v1 = vld [vmem:[%s862_s7 + $0x20] sm:$0xff]  ;;  %v213_v3 = vld [vmem:[%s862_s7 + $0x18] sm:$0xff] }
  0x27   :  { %158 = vmatpush.msra.mxu1 %v113_v27  ;;  %197 = vmatpush.msra.mxu2 %v176_v37  ;;  %v471_v2 = vld [vmem:[%s859_s4] ss:$0 sm:$0xff]  ;;  %v212_v9 = vld [vmem:[%s862_s7 + $0x10] sm:$0xff]  ;;  %v211_v10 = vld [vmem:[%s862_s7 + $0x8] sm:$0xff] }
  0x28   :  { %139 = vmatpush.msra.mxu0 %v96_v29  ;;  %233 = vmatpush.msra.mxu3 %v222_v54  ;;  %v210_v11 = vld [vmem:[%s862_s7] sm:$0xff]  ;;  %v281_v13 = vld [vmem:[%s864_s9 + $0x8] sm:$0xff] }
  0x29   :  { %159 = vmatpush.msra.mxu1 %v112_v30  ;;  %198 = vmatpush.msra.mxu2 %v175_v40  ;;  %v280_v12 = vld [vmem:[%s864_s9] sm:$0xff]  ;;  %s633_s9 = smov 16  }
  0x2a   :  { %140 = vmatpush.msra.mxu0 %v95_v32  ;;  %288 = vmax.xlane.f32.xlu0 %v287_v57  ;;  %v284_v14 = vmax.f32 %v280_v12, %v281_v13  ;;  %v472_v15 = vld [vmem:[%s861_s6] ss:$0 sm:$0xff] }
  0x2b   :  { %160 = vmatpush.msra.mxu1 %v111_v33  ;;  %199 = vmatpush.msra.mxu2 %v174_v45  ;;  %v473_v32 = vld [vmem:[%s863_s8] ss:$0 sm:$0xff]  ;;  %s634_s8 = smov 112  }
  0x2c   :  { %141 = vmatpush.msra.mxu0 %v94_v35  ;;  %234 = vmatpush.msra.mxu3 %v221_v58 }
  0x2d   :  { %161 = vmatpush.msra.mxu1 %v110_v36  ;;  %200 = vmatpush.msra.mxu2 %v173_v46 }
  0x2e   :  { %142 = vmatpush.msra.mxu0 %v93_v38  ;;  %235 = vmatpush.msra.mxu3 %v220_v59 }
  0x2f   :  { %162 = vmatpush.msra.mxu1 %v109_v39  ;;  %201 = vmatpush.msra.mxu2 %v172_v47 }
  0x30   :  { %143 = vmatpush.msra.mxu0 %v92_v41  ;;  %236 = vmatpush.msra.mxu3 %v219_v60 }
  0x31   :  { %163 = vmatpush.msra.mxu1 %v108_v42  ;;  %144 = vmatmul.f32.vlgmr.msra.gmra.mxu0 %v90_v43 }
  0x32   :  { %164 = vmatmul.f32.vlgmr.msra.gmra.mxu1 %v91_v44  ;;  %202 = vmatpush.msra.mxu2 %v171_v48 }
  0x33   :  { %237 = vmatpush.msra.mxu3 %v218_v61  ;;  %285 = vmax.xlane.f32.xlu0 %v284_v14 }
  0x34   :  { %203 = vmatpush.msra.mxu2 %v170_v49 }
  0x35   :  { %238 = vmatpush.msra.mxu3 %v217_v62 }
  0x36   :  { %204 = vmatpush.msra.mxu2 %v169_v50 }
  0x37   :  { %239 = vmatpush.msra.mxu3 %v216_v63  ;;  %v474_v63 = vld [vmem:[%s865_s10] ss:$0 sm:$0xff] }
  0x39   :  { %240 = vmatpush.msra.mxu3 %v215_v0 }
  0x3b   :  { %241 = vmatpush.msra.mxu3 %v214_v1 }
  0x3d   :  { %242 = vmatpush.msra.mxu3 %v213_v3 }
  0x3f   :  { %243 = vmatpush.msra.mxu3 %v212_v9  ;;  %v475_v9 = vld [vmem:[#allocation2] ss:$0 sm:$0xff] }
  0x41   :  { %244 = vmatpush.msra.mxu3 %v211_v10  ;;  %v387_v10 = vld [vmem:[%s857_s2] sm:$0xff] }
  0x43   :  { %245 = vmatpush.msra.mxu3 %v210_v11 }
  0x9d   :  { %v289_v19 = vpop.xlane.xlu0 %288 }
  0x9e   :  { %v292_v28 = vsub.f32 %v282_v55, %v289_v19  ;;  %v293_v29 = vsub.f32 %v283_v56, %v289_v19  ;;  %v364_v19 = vld [vmem:[#allocation6 + $0x8] sm:$0xff] }
  0xa0   :  { %v298_v30 = vmul.f32 1.442695, %v292_v28  ;;  %v300_v31 = vmul.f32 1.442695, %v293_v29 }
  0xa6   :  { %v286_v20 = vpop.xlane.xlu0 %285 }
  0xa7   :  { %v290_v21 = vsub.f32 %v280_v12, %v286_v20  ;;  %v291_v22 = vsub.f32 %v281_v13, %v286_v20 }
  0xa9   :  { %v294_v23 = vmul.f32 1.442695, %v290_v21  ;;  %v296_v24 = vmul.f32 1.442695, %v291_v22 }
  0xab   :  { %476 = vpow2.f32 %v294_v23 }
  0xac   :  { %478 = vpow2.f32 %v296_v24 }
  0xad   :  { %480 = vpow2.f32 %v298_v30 }
  0xae   :  { %v145_v4 = vpop.f32.mrf.mxu0  ;;  %482 = vpow2.f32 %v300_v31 }
  0xaf   :  { %v165_v5 = vpop.f32.mrf.mxu1  ;;  %v146_v6 = vadd.f32 %v471_v2, %v145_v4  ;;  %v635_v4 = vmov 0  }
  0xb0   :  { %470 = vset.pattern.permute.xlu0 %v635_v4 }
  0xb1   :  { %v166_v7 = vadd.f32 %v165_v5, %v146_v6  ;;  %v477_v25 = vpop.eup %476 }
  0xb2   :  { %v479_v26 = vpop.eup %478 }
  0xb3   :  { %v168_v8 = vmax.f32 %v166_v7, 0.0  ;;  %v302_v27 = vadd.f32 %v479_v26, %v477_v25  ;;  %v481_v37 = vpop.eup %480 }
  0xb4   :  { %v483_v38 = vpop.eup %482 }
  0xb5   :  { %205 = vmatmul.f32.vlgmr.msra.gmra.mxu2 %v168_v8  ;;  %303 = vadd.xlane.f32.xlu2 %v302_v27  ;;  %v305_v39 = vadd.f32 %v483_v38, %v481_v37 }
 0x128   :  { %v304_v43 = vpop.xlane.xlu2 %303 }
 0x138   :  { %v206_v16 = vpop.f32.mrf.mxu2 }
 0x139   :  { %v207_v17 = vadd.f32 %v472_v15, %v206_v16  ;;  %v363_v16 = vld [vmem:[#allocation6] sm:$0xff] }
 0x13b   :  { %v209_v18 = vmax.f32 %v207_v17, 0.0 }
 0x13d   :  { %246 = vmatmul.f32.vlgmr.msra.gmra.mxu3 %v209_v18 }
 0x1c0   :  { %v247_v33 = vpop.f32.mrf.mxu3 }
 0x1c1   :  { %v248_v34 = vadd.f32 %v473_v32, %v247_v33 }
 0x1c3   :  { %v269_v35 = vsel %vm264_vm0, %v248_v34, -inf  ;;  %v251_v36 = vmul.f32 %v248_v34, %v248_v34  ;;  %v257_v53 = vmul.f32 1.442695, %v248_v34  ;;  %v250_v55 = vadd.f32 1.0, %v248_v34 }
 0x1c4   :  { %270 = vmax.xlane.f32.xlu1 %v269_v35 }
 0x1c5   :  { %253 = vrot.lane.b32.xlu0 %v251_v36, %s633_s9 }
 0x1cc   :  { %306 = vadd.xlane.f32.xlu1 %v305_v39 }
 0x237   :  { %v271_v40 = vpop.xlane.xlu1 %270  ;;  %v254_v54 = vpop.permute.xlu0 %253 }
 0x238   :  { %v272_v41 = vsub.f32 %v248_v34, %v271_v40  ;;  %v256_v56 = vsub.f32 %v250_v55, %v254_v54 }
 0x23a   :  { %v273_v42 = vmul.f32 1.442695, %v272_v41 }
 0x23c   :  { %484 = vpow2.f32 %v273_v42 }
 0x23d   :  { %486 = vrcp.f32 %v304_v43 }
 0x23f   :  { %v307_v44 = vpop.xlane.xlu1 %306 }
 0x240   :  { %488 = vrcp.f32 %v307_v44 }
 0x241   :  { %490 = vpow2.f32 %v257_v53 }
 0x242   :  { %v485_v45 = vpop.eup %484 }
 0x243   :  { %v275_v46 = vsel %vm264_vm0, %v485_v45, 0.0  ;;  %v487_v47 = vpop.eup %486 }
 0x244   :  { %276 = vadd.xlane.f32.xlu2 %v275_v46  ;;  %v310_v51 = vmul.f32 %v487_v47, %v477_v25  ;;  %v311_v52 = vmul.f32 %v487_v47, %v479_v26 }
 0x246   :  { %v489_v48 = vpop.eup %488 }
 0x247   :  { %v312_v49 = vmul.f32 %v489_v48, %v481_v37  ;;  %v313_v50 = vmul.f32 %v489_v48, %v483_v38  ;;  %v491_v57 = vpop.eup %490  ;;  %v410_v38 = vlaneseq }
 0x248   :  { %v259_v58 = vsub.f32 %v256_v56, %v491_v57 }
 0x249   :  { %331 = vmatpush.msrb.mxu0 %v312_v49  ;;  %351 = vmatpush.msrb.mxu1 %v313_v50  ;;  %v411_v44 = vand.u32 127, %v410_v38 }
 0x24b   :  { %332 = vmatpush.msrb.mxu0 %v310_v51  ;;  %352 = vmatpush.msrb.mxu1 %v311_v52  ;;  %vm412_vm2 = vcmp.eq.s32.totalorder %v411_v44, 0  ;;  %vm414_vm3 = vcmp.eq.s32.totalorder %v411_v44, 1  ;;  %vm421_vm4 = vcmp.eq.s32.totalorder %v411_v44, 2 }
 0x25c   :  { %261 = vrot.lane.b32.xlu2 %v259_v58, %s634_s8 }
 0x2b7   :  { %v277_v59 = vpop.xlane.xlu2 %276 }
 0x2b8   :  { %492 = vrcp.f32 %v277_v59 }
 0x2be   :  { %v493_v60 = vpop.eup %492 }
 0x2bf   :  { %v279_v61 = vmul.f32 %v493_v60, %v485_v45  ;;  %v262_v30 = vpop.permute.xlu2 %261 }
 0x2c0   :  { %v265_v32 = vsel %vm264_vm0, %v262_v30, 0.0 }
 0x2c1   :  { %458 = vmatmul.msk.f32.vlgmr.msrb.gmra.mxu0 %vm264_vm0, %v279_v61  ;;  %459 = vmatmul.msk.f32.vlgmr.msrb.gmra.mxu1 %vm264_vm0, %v279_v61  ;;  %v371_v62 = vadd.f32 1e-06, %v279_v61 }
 0x2c3   :  { %494 = vlog2.f32 %v371_v62 }
 0x2c9   :  { %v495_v0 = vpop.eup %494 }
 0x2ca   :  { %v373_v1 = vmul.f32 0.6931472, %v495_v0 }
 0x2cc   :  { %v378_v2 = vmul.f32 %v474_v63, %v373_v1 }
 0x2ce   :  { %v379_v3 = vsel %vm264_vm0, %v378_v2, 0.0 }
 0x2cf   :  { %380 = vadd.xlane.f32.xlu1 %v379_v3 }
 0x33e   :  { %v334_v5 = vpop.f32.mrf.mxu0  ;;  %v354_v6 = vpop.f32.mrf.mxu1 }
 0x33f   :  { %v335_v7 = vadd.f32 1e-06, %v334_v5  ;;  %v355_v8 = vadd.f32 1e-06, %v354_v6 }
 0x341   :  { %496 = vlog2.f32 %v335_v7 }
 0x342   :  { %498 = vlog2.f32 %v355_v8  ;;  %v381_v11 = vpop.xlane.xlu1 %380 }
 0x343   :  { %v386_v12 = vadd.f32 %v475_v9, %v381_v11 }
 0x345   :  { %v388_v13 = vsub.f32 %v386_v12, %v387_v10 }
 0x347   :  { %v497_v14 = vpop.eup %496  ;;  %v395_v15 = vmul.f32 %v388_v13, %v388_v13 }
 0x348   :  { %v499_v17 = vpop.eup %498  ;;  %v358_v18 = vmul.f32 0.6931472, %v497_v14 }
 0x349   :  { %v360_v20 = vmul.f32 0.6931472, %v499_v17  ;;  %v397_v21 = vsel %vm396_vm1, %v395_v15, 0.0 }
 0x34a   :  { %361 = vst [vmem:[#allocation9] sm:$0xff] %v358_v18  ;;  %v398_v22 = vrot.slane %v397_v21, 4  ;;  %v365_v23 = vmul.f32 %v363_v16, %v358_v18 }
 0x34b   :  { %362 = vst [vmem:[#allocation9 + $0x8] sm:$0xff] %v360_v20  ;;  %v366_v24 = vmul.f32 %v364_v19, %v360_v20 }
 0x34c   :  { %v399_v25 = vadd.f32 %v398_v22, %v397_v21  ;;  %434 = dma.vmem_to_hbm [thread:$0]  %s430_s21, 256, %s432_s19, [#allocation5]  }
 0x34d   :  { %v367_v26 = vadd.f32 %v366_v24, %v365_v23 }
 0x34e   :  { %v400_v27 = vrot.slane %v399_v25, 2 }
 0x34f   :  { %368 = vadd.xlane.f32.xlu1 %v367_v26 }
 0x350   :  { %v401_v28 = vadd.f32 %v400_v27, %v399_v25 }
 0x352   :  { %v402_v29 = vrot.slane %v401_v28, 1 }
 0x354   :  { %v403_v31 = vadd.f32 %v402_v29, %v401_v28 }
 0x356   :  { %417 = vperm.xlu0 %470, %v403_v31  }
 0x357   :  { %266 = vadd.xlane.f32.xlu1 %v265_v32 }
 0x3c2   :  { %v369_v33 = vpop.xlane.xlu1 %368 }
 0x3c3   :  { %v370_v34 = vsub.f32 0.0, %v369_v33 }
 0x3c5   :  { %v389_v35 = vrot.slane %v370_v34, 4 }
 0x3c7   :  { %v390_v36 = vadd.f32 %v389_v35, %v370_v34 }
 0x3c8   :  { %v418_v51 = vpop.permute.xlu0 %417 }
 0x3c9   :  { %v391_v37 = vrot.slane %v390_v36, 2 }
 0x3ca   :  { %v267_v39 = vpop.xlane.xlu1 %266 }
 0x3cb   :  { %v392_v40 = vadd.f32 %v391_v37, %v390_v36  ;;  %v268_v41 = vmul.f32 -0.5, %v267_v39 }
 0x3cd   :  { %v393_v42 = vrot.slane %v392_v40, 1  ;;  %v404_v43 = vrot.slane %v268_v41, 4 }
 0x3cf   :  { %v405_v45 = vadd.f32 %v404_v43, %v268_v41  ;;  %v394_v46 = vadd.f32 %v393_v42, %v392_v40 }
 0x3d1   :  { %v406_v47 = vrot.slane %v405_v45, 2  ;;  %v413_v49 = vsel %vm412_vm2, %v394_v46, 0.0 }
 0x3d2   :  { %v420_v53 = vsel %vm414_vm3, %v418_v51, %v413_v49 }
 0x3d3   :  { %v407_v48 = vadd.f32 %v406_v47, %v405_v45 }
 0x3d5   :  { %v408_v50 = vrot.slane %v407_v48, 1 }
 0x3d7   :  { %v409_v52 = vadd.f32 %v408_v50, %v407_v48 }
 0x3d9   :  { %v422_v54 = vsel %vm421_vm4, %v409_v52, %v420_v53 }
 0x3da   :  { %423 = vst [vmem:[#allocation10] sm:$0xff] %v422_v54 }
 0x3db   :  { %445 = dma.vmem_to_hbm [thread:$0]  %s441_s1, 128, %s443_s23, [#allocation11]  }
 0x3dc   :  { %624 = dma.done.wait [#allocation5], 256  }
 0x3dd   :  { %625 = vsyncadd [#allocation5], 4294967040 }
 0x3de   :  { %626 = dma.done.wait [#allocation11], 128  }
 0x3df   :  { %627 = vsyncadd [#allocation11], 4294967168 }
 0x3e0   :  { %454 = vsyncpa [#allocation4], 1 }
 0x3e1   :  { %455 = vsyncpa [#allocation7], 1 }
 0x3e2   :  { %456 = vsyncpa [#allocation5], 1 }
 0x3e3   :  { %457 = vsyncpa [#allocation11], 1 }

</bundles_post_ra>
